<compile_context>
chip_gen: v7x
topology: tpu7x:2x2x1
jax: 0.10.0
libtpu: 0.0.40
codegen_flags: <defaults>
</compile_context>

<pallas_src>
import jax
import jax.numpy as jnp
from jax.experimental import pallas as pl
from jax.experimental.pallas import tpu as pltpu

D_MODEL = 128
VOCAB_SIZE = 5        # {'[PAD]', '[CLS]', '[SEP]', '[MASK]', '[END]'}
MAX_LEN = 16          # maxlen (= max_length in the source)
N_SEGMENTS = 16       # n_segments (= max_length in the source)
BATCH = 2
SEQ = 8
LN_EPS = 1e-5         # torch.nn.LayerNorm default


# ----------------------------- Pallas kernel ------------------------------

def _embed_ln_kernel(tok_ref, pos_ref, seg_ref, table_ref, gb_ref, o_ref):
    """Fused (tok + pos + seg) embedding lookup + LayerNorm.

    tok/pos/seg: (M, 1) int32 indices, already offset into the packed table.
    table:       (V, D) packed [tok_embed; pos_embed; seg_embed] rows.
    gb:          (2, D) packed LayerNorm (gamma; beta).
    o:           (M, D) float32 output.
    """
    M = tok_ref.shape[0]
    V = table_ref.shape[0]

    col = jax.lax.broadcasted_iota(jnp.int32, (M, V), 1)
    # Multi-hot with exactly three ones per row (index ranges are disjoint),
    # so a single MXU matmul produces tok_emb + pos_emb + seg_emb directly.
    multi_hot = ((col == tok_ref[...]).astype(jnp.float32)
                 + (col == pos_ref[...]).astype(jnp.float32)
                 + (col == seg_ref[...]).astype(jnp.float32))
    emb = jnp.dot(multi_hot, table_ref[...], preferred_element_type=jnp.float32)

    # LayerNorm over the feature dim (biased variance, like torch.nn.LayerNorm).
    mean = jnp.mean(emb, axis=-1, keepdims=True)
    var = jnp.mean((emb - mean) ** 2, axis=-1, keepdims=True)
    yhat = (emb - mean) * jax.lax.rsqrt(var + LN_EPS)

    gamma = gb_ref[0:1, :]
    beta = gb_ref[1:2, :]
    o_ref[...] = (yhat * gamma + beta).astype(o_ref.dtype)


# ----------------------------- Module wrapper -----------------------------

def init_params(key):
    k1, k2, k3 = jax.random.split(key, 3)
    return {
        "tok_embed": jax.random.normal(k1, (VOCAB_SIZE, D_MODEL), jnp.float32),
        "pos_embed": jax.random.normal(k2, (MAX_LEN, D_MODEL), jnp.float32),
        "seg_embed": jax.random.normal(k3, (N_SEGMENTS, D_MODEL), jnp.float32),
        "ln_g": jnp.ones((D_MODEL,), jnp.float32),
        "ln_b": jnp.zeros((D_MODEL,), jnp.float32),
    }


def bert_embedding(params, x, seg):
    """x, seg: (B, S) integer ids.  Returns (B, S, D_MODEL) float32."""
    B, S = x.shape
    M = B * S

    # Indices offset into the packed [tok | pos | seg] table (done once, tiny).
    tok_ids = x.reshape(M, 1).astype(jnp.int32)
    pos = jnp.broadcast_to(jnp.arange(S, dtype=jnp.int32)[None, :], (B, S))
    pos_ids = pos.reshape(M, 1) + VOCAB_SIZE
    seg_ids = seg.reshape(M, 1).astype(jnp.int32) + (VOCAB_SIZE + MAX_LEN)

    table = jnp.concatenate(
        [params["tok_embed"], params["pos_embed"], params["seg_embed"]], axis=0)
    V = VOCAB_SIZE + MAX_LEN + N_SEGMENTS
    gb = jnp.stack([params["ln_g"], params["ln_b"]], axis=0)   # (2, D)

    out = pl.pallas_call(
        _embed_ln_kernel,
        out_shape=jax.ShapeDtypeStruct((M, D_MODEL), jnp.float32),
        grid=(1,),
        in_specs=[
            pl.BlockSpec((M, 1), lambda i: (0, 0)),
            pl.BlockSpec((M, 1), lambda i: (0, 0)),
            pl.BlockSpec((M, 1), lambda i: (0, 0)),
            pl.BlockSpec((V, D_MODEL), lambda i: (0, 0)),
            pl.BlockSpec((2, D_MODEL), lambda i: (0, 0)),
        ],
        out_specs=pl.BlockSpec((M, D_MODEL), lambda i: (0, 0)),
        compiler_params=pltpu.CompilerParams(
            dimension_semantics=("arbitrary",)),
    )(tok_ids, pos_ids, seg_ids, table, gb)

    return out.reshape(B, S, D_MODEL)


if __name__ == "__main__":
    key = jax.random.PRNGKey(0)
    pkey, xkey, skey = jax.random.split(key, 3)
    params = init_params(pkey)

    x = jax.random.randint(xkey, (BATCH, SEQ), 0, VOCAB_SIZE, dtype=jnp.int32)
    seg = jax.random.randint(skey, (BATCH, SEQ), 0, 2, dtype=jnp.int32)

    out = jax.jit(bert_embedding)(params, x, seg)
    jax.block_until_ready(out)

    # Pure-JAX reference (same math as the PyTorch module).
    pos = jnp.broadcast_to(jnp.arange(SEQ)[None, :], (BATCH, SEQ))
    emb = (params["tok_embed"][x]
           + params["pos_embed"][pos]
           + params["seg_embed"][seg])
    mean = emb.mean(-1, keepdims=True)
    var = ((emb - mean) ** 2).mean(-1, keepdims=True)
    ref = (emb - mean) / jnp.sqrt(var + LN_EPS) * params["ln_g"] + params["ln_b"]

    assert out.shape == (BATCH, SEQ, D_MODEL)
    assert bool(jnp.all(jnp.isfinite(out)))
    assert bool(jnp.allclose(out, ref, atol=1e-5, rtol=1e-5))
    print("KERNEL_OK")
</pallas_src>

<mosaic_0001>
module attributes {stable_mosaic.version = 11 : i64} {
  func.func @_embed_ln_kernel(%arg0: i32, %arg1: memref<16x1xi32, #tpu.memory_space<vmem>>, %arg2: memref<16x1xi32, #tpu.memory_space<vmem>>, %arg3: memref<16x1xi32, #tpu.memory_space<vmem>>, %arg4: memref<37x128xf32, #tpu.memory_space<vmem>>, %arg5: memref<2x128xf32, #tpu.memory_space<vmem>>, %arg6: memref<16x128xf32, #tpu.memory_space<vmem>>) attributes {dimension_semantics = [#tpu.dimension_semantics<arbitrary>], iteration_bounds = array<i64: 1>, scalar_prefetch = 0 : i64, scratch_operands = 0 : i64, tpu.core_type = #tpu.core_type<tc>, window_params = [{pipeline_mode = #tpu.pipeline_mode<synchronous>, transform_indices = @transform_0, window_bounds = array<i64: 16, 1>}, {pipeline_mode = #tpu.pipeline_mode<synchronous>, transform_indices = @transform_1, window_bounds = array<i64: 16, 1>}, {pipeline_mode = #tpu.pipeline_mode<synchronous>, transform_indices = @transform_2, window_bounds = array<i64: 16, 1>}, {pipeline_mode = #tpu.pipeline_mode<synchronous>, transform_indices = @transform_3, window_bounds = array<i64: 37, 128>}, {pipeline_mode = #tpu.pipeline_mode<synchronous>, transform_indices = @transform_4, window_bounds = array<i64: 2, 128>}, {pipeline_mode = #tpu.pipeline_mode<synchronous>, transform_indices = @transform_5, window_bounds = array<i64: 16, 128>}]} {
    %0 = tpu.iota {dimensions = array<i32: 1>} : vector<16x37xi32>
    %c0 = arith.constant 0 : index
    %c0_0 = arith.constant 0 : index
    %1 = vector.load %arg1[%c0, %c0_0] : memref<16x1xi32, #tpu.memory_space<vmem>>, vector<16x1xi32>
    %2 = vector.broadcast %1 : vector<16x1xi32> to vector<16x37xi32>
    %3 = arith.cmpi eq, %0, %2 : vector<16x37xi32>
    %4 = arith.extui %3 : vector<16x37xi1> to vector<16x37xi32>
    %5 = arith.sitofp %4 : vector<16x37xi32> to vector<16x37xf32>
    %c0_1 = arith.constant 0 : index
    %c0_2 = arith.constant 0 : index
    %6 = vector.load %arg2[%c0_1, %c0_2] : memref<16x1xi32, #tpu.memory_space<vmem>>, vector<16x1xi32>
    %7 = vector.broadcast %6 : vector<16x1xi32> to vector<16x37xi32>
    %8 = arith.cmpi eq, %0, %7 : vector<16x37xi32>
    %9 = arith.extui %8 : vector<16x37xi1> to vector<16x37xi32>
    %10 = arith.sitofp %9 : vector<16x37xi32> to vector<16x37xf32>
    %11 = arith.addf %5, %10 : vector<16x37xf32>
    %c0_3 = arith.constant 0 : index
    %c0_4 = arith.constant 0 : index
    %12 = vector.load %arg3[%c0_3, %c0_4] : memref<16x1xi32, #tpu.memory_space<vmem>>, vector<16x1xi32>
    %13 = vector.broadcast %12 : vector<16x1xi32> to vector<16x37xi32>
    %14 = arith.cmpi eq, %0, %13 : vector<16x37xi32>
    %15 = arith.extui %14 : vector<16x37xi1> to vector<16x37xi32>
    %16 = arith.sitofp %15 : vector<16x37xi32> to vector<16x37xf32>
    %17 = arith.addf %11, %16 : vector<16x37xf32>
    %c0_5 = arith.constant 0 : index
    %c0_6 = arith.constant 0 : index
    %18 = vector.load %arg4[%c0_5, %c0_6] : memref<37x128xf32, #tpu.memory_space<vmem>>, vector<37x128xf32>
    %cst = arith.constant dense<0.000000e+00> : vector<16x128xf32>
    %19 = tpu.matmul %17, %18, %cst {dimension_numbers = #tpu.dot_dimension_numbers<[1], [0], [0], [1], [0, 0, 1, 1], [], []>} : vector<16x37xf32>, vector<37x128xf32>, vector<16x128xf32> -> vector<16x128xf32>
    %cst_7 = arith.constant dense<0.000000e+00> : vector<16xf32>
    %20 = vector.multi_reduction <add>, %19, %cst_7 [1] : vector<16x128xf32> to vector<16xf32>
    %21 = vector.shape_cast %20 : vector<16xf32> to vector<16x1xf32>
    %cst_8 = arith.constant 1.280000e+02 : f32
    %22 = vector.broadcast %cst_8 : f32 to vector<16x1xf32>
    %23 = arith.divf %21, %22 : vector<16x1xf32>
    %24 = vector.broadcast %23 : vector<16x1xf32> to vector<16x128xf32>
    %25 = arith.subf %19, %24 : vector<16x128xf32>
    %26 = arith.mulf %25, %25 : vector<16x128xf32>
    %cst_9 = arith.constant dense<0.000000e+00> : vector<16xf32>
    %27 = vector.multi_reduction <add>, %26, %cst_9 [1] : vector<16x128xf32> to vector<16xf32>
    %28 = vector.shape_cast %27 : vector<16xf32> to vector<16x1xf32>
    %cst_10 = arith.constant 1.280000e+02 : f32
    %29 = vector.broadcast %cst_10 : f32 to vector<16x1xf32>
    %30 = arith.divf %28, %29 : vector<16x1xf32>
    %31 = vector.broadcast %23 : vector<16x1xf32> to vector<16x128xf32>
    %32 = arith.subf %19, %31 : vector<16x128xf32>
    %cst_11 = arith.constant 9.99999974E-6 : f32
    %33 = vector.broadcast %cst_11 : f32 to vector<16x1xf32>
    %34 = arith.addf %30, %33 : vector<16x1xf32>
    %35 = math.rsqrt %34 : vector<16x1xf32>
    %36 = vector.broadcast %35 : vector<16x1xf32> to vector<16x128xf32>
    %37 = arith.mulf %32, %36 : vector<16x128xf32>
    %c0_12 = arith.constant 0 : index
    %c0_13 = arith.constant 0 : index
    %38 = vector.load %arg5[%c0_12, %c0_13] : memref<2x128xf32, #tpu.memory_space<vmem>>, vector<1x128xf32>
    %c1 = arith.constant 1 : index
    %c0_14 = arith.constant 0 : index
    %39 = vector.load %arg5[%c1, %c0_14] : memref<2x128xf32, #tpu.memory_space<vmem>>, vector<1x128xf32>
    %40 = vector.broadcast %38 : vector<1x128xf32> to vector<16x128xf32>
    %41 = arith.mulf %37, %40 : vector<16x128xf32>
    %42 = vector.broadcast %39 : vector<1x128xf32> to vector<16x128xf32>
    %43 = arith.addf %41, %42 : vector<16x128xf32>
    %c0_15 = arith.constant 0 : index
    %c0_16 = arith.constant 0 : index
    %44 = vector.load %arg6[%c0_15, %c0_16] : memref<16x128xf32, #tpu.memory_space<vmem>>, vector<16x128xf32>
    tpu.vector_store %arg6[%c0_15, %c0_16], %43 {strides = array<i32>} : memref<16x128xf32, #tpu.memory_space<vmem>>, vector<16x128xf32>,
    return
  }
  func.func @transform_0(%arg0: i32) -> (i32, i32) {
    %c0_i32 = arith.constant 0 : i32
    %c0_i32_0 = arith.constant 0 : i32
    %c0_i32_1 = arith.constant 0 : i32
    return %c0_i32, %c0_i32_0 : i32, i32
  }
  func.func @transform_1(%arg0: i32) -> (i32, i32) {
    %c0_i32 = arith.constant 0 : i32
    %c0_i32_0 = arith.constant 0 : i32
    %c0_i32_1 = arith.constant 0 : i32
    return %c0_i32, %c0_i32_0 : i32, i32
  }
  func.func @transform_2(%arg0: i32) -> (i32, i32) {
    %c0_i32 = arith.constant 0 : i32
    %c0_i32_0 = arith.constant 0 : i32
    %c0_i32_1 = arith.constant 0 : i32
    return %c0_i32, %c0_i32_0 : i32, i32
  }
  func.func @transform_3(%arg0: i32) -> (i32, i32) {
    %c0_i32 = arith.constant 0 : i32
    %c0_i32_0 = arith.constant 0 : i32
    %c0_i32_1 = arith.constant 0 : i32
    return %c0_i32, %c0_i32_0 : i32, i32
  }
  func.func @transform_4(%arg0: i32) -> (i32, i32) {
    %c0_i32 = arith.constant 0 : i32
    %c0_i32_0 = arith.constant 0 : i32
    %c0_i32_1 = arith.constant 0 : i32
    return %c0_i32, %c0_i32_0 : i32, i32
  }
  func.func @transform_5(%arg0: i32) -> (i32, i32) {
    %c0_i32 = arith.constant 0 : i32
    %c0_i32_0 = arith.constant 0 : i32
    %c0_i32_1 = arith.constant 0 : i32
    return %c0_i32, %c0_i32_0 : i32, i32
  }
}

</mosaic_0001>

<bundles_post_ra>
// kernel: bert_embedding.1
= control target key start
LH: loop header
LB: loop body
LE: loop exit
PB: predicated region body
PF: predicated region fallthrough
CT: control target
= control target key end

     0   :  { %v289_v2 = vmov 0   ;;  %s375_s0 = inlined_call_operand.vmem [shape: s32[16,1], index: 0, kind: input, shape index: {}]   ;;  %s376_s1 = inlined_call_operand.vmem [shape: s32[16,1], index: 1, kind: input, shape index: {}]   ;;  %s377_s2 = inlined_call_operand.vmem [shape: s32[16,1], index: 2, kind: input, shape index: {}]   ;;  %s378_s3 = inlined_call_operand.vmem [shape: f32[37,128], index: 3, kind: input, shape index: {}]   ;;  %s379_s4 = inlined_call_operand.vmem [shape: f32[2,128], index: 4, kind: input, shape index: {}]   ;;  %s380_s5 = inlined_call_operand.hbm [shape: f32[16,128], index: 5, kind: output, shape index: {}]  }
   0x1   :  { %v24_v0 = vld [vmem:[%s375_s0 + $0x8] sm:$0xff]  ;;  %v23_v1 = vld [vmem:[%s375_s0] sm:$0xff]  ;;  %260 = vset.pattern.permute.xlu1 %v289_v2  ;;  %259 = vset.pattern.permute.xlu0 %v289_v2 }
   0x2   :  { %29 = vperm.xlu1 %260, %v24_v0   ;;  %26 = vperm.xlu0 %259, %v23_v1   ;;  %v69_v3 = vld [vmem:[%s378_s3] sm:$0xff]  ;;  %v70_v4 = vld [vmem:[%s378_s3 + $0x8] sm:$0xff] }
   0x3   :  { %10 = vsyncpa [#allocation3], 0  ;;  %v38_v5 = vld [vmem:[%s376_s1 + $0x8] sm:$0xff]  ;;  %v37_v6 = vld [vmem:[%s376_s1] sm:$0xff]  ;;  %v246_v7 = vpack.c.bf16 %v70_v4, %v69_v3  ;;  %vm81_vm0 = vcmask 1044480   ;;  %v21_v14 = vlaneseq  ;;  %v290_v20 = vmov 0.0  }
   0x4   :  { %v71_v8 = vld [vmem:[%s378_s3 + $0x10] sm:$0xff]  ;;  %v72_v9 = vld [vmem:[%s378_s3 + $0x18] sm:$0xff]  ;;  %v54_v10 = vld [vmem:[%s377_s2 + $0x8] sm:$0xff]  ;;  %vm74_vm7 = vcmask 302080   ;;  %s291_s15 = smov [#allocation2]  }
   0x5   :  { %247 = vmatprep.subr.bf16.mxu0 %v246_v7  ;;  %v53_v11 = vld [vmem:[%s377_s2] sm:$0xff]  ;;  %v250_v12 = vpack.c.bf16 %v72_v9, %v71_v8  ;;  %v22_v17 = vand.u32 127, %v21_v14  ;;  %s204_s16 = sshll.u32 %s291_s15, 4  ;;  %s205_s16 = int_to_ptr.vmem [resolvable:$true] %s204_s16 }
   0x6   :  { %43 = vperm.xlu1 %260, %v38_v5   ;;  %40 = vperm.xlu0 %259, %v37_v6   ;;  %v73_v13 = vld [vmem:[%s378_s3 + $0x20] sm:$0x1f]  ;;  %s265_s17 = scalar_lea.vmem %s205_s16, 256  ;;  %p270_p1 = scmp.lt.s32.totalorder %s205_s16, %s205_s16 }
   0x7   :  { %249 = vmatpush3.bf16.msra.mxu0 %v246_v7  ;;  %v224_v50 = vld [vmem:[%s379_s4] ss:$0 sm:$0xff]  ;;  %v225_v52 = vld [vmem:[%s379_s4 + $0x1] ss:$0 sm:$0xff]  ;;  %p266_p0 = scmp.ne.s32.totalorder %s205_s16, %s265_s17  ;;  %p271_p2 = scmp.lt.s32.totalorder %s265_s17, %s265_s17 }
   0x8   :  { %251 = vmatprep.subr.bf16.mxu0 %v250_v12 }
   0x9   :  { %p272_p3 = por %p271_p2, %p270_p1 }
   0xa   :  { %59 = vperm.xlu1 %260, %v54_v10   ;;  %56 = vperm.xlu0 %259, %v53_v11  }
   0xb   :  { %253 = vmatpush3.bf16.msra.mxu0 %v250_v12  ;;  %p273_p4 = pnand %p272_p3, %p266_p0 }
   0xc   :  { %241 = vmatprep.subr.msk.mxu0 %vm81_vm0, %v73_v13 }
   0xf   :  { %242 = vmatpush3.msk.msra.mxu0 %vm81_vm0, %v73_v13 }
  0x81   :  { %v30_v15 = vpop.permute.xlu1 %29  ;;  %v27_v16 = vpop.permute.xlu0 %26 }
  0x82   :  { %vm32_vm1 = vcmp.eq.s32.totalorder %v22_v17, %v30_v15  ;;  %vm31_vm2 = vcmp.eq.s32.totalorder %v22_v17, %v27_v16 }
  0x83   :  { %v216_v23 = vsel %vm32_vm1, 1.0, %v290_v20  ;;  %v215_v24 = vsel %vm31_vm2, 1.0, %v290_v20 }
  0x85   :  { %v44_v18 = vpop.permute.xlu1 %43  ;;  %v41_v19 = vpop.permute.xlu0 %40 }
  0x86   :  { %vm46_vm3 = vcmp.eq.s32.totalorder %v22_v17, %v44_v18  ;;  %vm45_vm4 = vcmp.eq.s32.totalorder %v22_v17, %v41_v19 }
  0x87   :  { %v218_v21 = vsel %vm46_vm3, 1.0, %v290_v20  ;;  %v217_v22 = vsel %vm45_vm4, 1.0, %v290_v20 }
  0x88   :  { %v52_v27 = vadd.f32 %v218_v21, %v216_v23  ;;  %v51_v28 = vadd.f32 %v217_v22, %v215_v24 }
  0x89   :  { %v60_v25 = vpop.permute.xlu1 %59  ;;  %v57_v26 = vpop.permute.xlu0 %56 }
  0x8a   :  { %vm62_vm5 = vcmp.eq.s32.totalorder %v22_v17, %v60_v25  ;;  %vm61_vm6 = vcmp.eq.s32.totalorder %v22_v17, %v57_v26 }
  0x8b   :  { %v220_v29 = vsel %vm62_vm5, 1.0, %v290_v20  ;;  %v219_v30 = vsel %vm61_vm6, 1.0, %v290_v20 }
  0x8c   :  { %v68_v31 = vadd.f32 %v220_v29, %v52_v27  ;;  %v67_v32 = vadd.f32 %v219_v30, %v51_v28 }
  0x8e   :  { %243 = vmatprep.mubr.msk.f32.mxu0 %vm74_vm7, %v67_v32 }
  0x8f   :  { %244 = vmatmul.mubr.msk.f32.vlgmr.msra.gmra.mrb[0].mxu0 %vm74_vm7, %v68_v31 }
 0x162   :  { %v245_v33 = vpop.f32.mrb[0].mxu0 }
 0x163   :  { %162 = vadd.xlane.f32.xlu1 %v245_v33  ;;  %v151_v34 = vpop.f32.mrb[1].mxu0 }
 0x164   :  { %160 = vadd.xlane.f32.xlu0 %v151_v34 }
 0x1f0   :  { %v163_v35 = vpop.xlane.xlu1 %162 }
 0x1f1   :  { %v161_v36 = vpop.xlane.xlu0 %160  ;;  %v166_v37 = vmul.f32 0.0078125, %v163_v35 }
 0x1f2   :  { %v165_v38 = vmul.f32 0.0078125, %v161_v36 }
 0x1f3   :  { %v168_v40 = vsub.f32 %v245_v33, %v166_v37 }
 0x1f4   :  { %v167_v39 = vsub.f32 %v151_v34, %v165_v38 }
 0x1f5   :  { %v170_v42 = vmul.f32 %v168_v40, %v168_v40 }
 0x1f6   :  { %v169_v41 = vmul.f32 %v167_v39, %v167_v39 }
 0x1f8   :  { %171 = vadd.xlane.f32.xlu0 %v169_v41 }
 0x1fc   :  { %173 = vadd.xlane.f32.xlu0 %v170_v42 }
 0x285   :  { %v172_v43 = vpop.xlane.xlu0 %171 }
 0x286   :  { %v175_v44 = vmul.f32 0.0078125, %v172_v43 }
 0x288   :  { %v177_v45 = vadd.f32 1e-05, %v175_v44 }
 0x289   :  { %v174_v46 = vpop.xlane.xlu0 %173 }
 0x28a   :  { %261 = vrsqrt.f32 %v177_v45  ;;  %v176_v47 = vmul.f32 0.0078125, %v174_v46 }
 0x28c   :  { %v178_v48 = vadd.f32 1e-05, %v176_v47 }
 0x28e   :  { %263 = vrsqrt.f32 %v178_v48 }
 0x294   :  { %v262_v49 = vpop.eup %261 }
 0x295   :  { %v181_v51 = vmul.f32 %v262_v49, %v167_v39 }
 0x297   :  { %v189_v53 = vmul.f32 %v224_v50, %v181_v51 }
 0x298   :  { %v264_v54 = vpop.eup %263 }
 0x299   :  { %v182_v55 = vmul.f32 %v264_v54, %v168_v40  ;;  %v195_v56 = vadd.f32 %v225_v52, %v189_v53 }
 0x29b   :  { %v190_v57 = vmul.f32 %v224_v50, %v182_v55  ;;  %197 = vst [vmem:[#allocation2] sm:$0xff] %v195_v56 }
 0x29d   :  { %v196_v58 = vadd.f32 %v225_v52, %v190_v57 }
 0x29f   :  { %198 = vst [vmem:[#allocation2 + $0x8] sm:$0xff] %v196_v58 }
 0x2a0   :  { %276 = shalt.err (!%p273_p4)
}
 0x2a1   :  { %s277_s19 = scalar_lea.hbm %s380_s5, 256 }
 0x2a2   :  { %p278_p5 = scmp.ne.s32.totalorder %s380_s5, %s277_s19  ;;  %p281_p6 = scmp.lt.u32.totalorder %s277_s19, %s380_s5 }
 0x2a4   :  { %p283_p7 = pnand %p281_p6, %p278_p5 }
 0x2a6   :  { %286 = shalt.err (!%p283_p7)
}
 0x2a7   :  { %s292_s24 = smov 128   ;;  %s293_s25 = smov 8  }
 0x2a8   :  { %210 = dma.vmem_to_hbm [thread:$0]  %s205_s16, 256, %s380_s5, [#allocation3], %s292_s24, %s292_s24, %s293_s25  }
 0x2a9   :  { %287 = dma.done.wait [#allocation3], 256  }
 0x2aa   :  { %288 = vsyncadd [#allocation3], 4294967040 }
 0x2ab   :  { %214 = vsyncpa [#allocation3], 1 }

</bundles_post_ra>
